<compile_context>
chip_gen: v7x
topology: tpu7x:2x2x1
jax: 0.10.0
libtpu: 0.0.40
codegen_flags: <defaults>
</compile_context>

<pallas_src>
import jax
import jax.numpy as jnp
from jax.experimental import pallas as pl
from jax.experimental.pallas import tpu as pltpu

_SQRT_HALF = 0.7071067811865476


def _erf_approx(x):
    """erf(x), Abramowitz & Stegun 7.1.26 (max abs err ~1.5e-7), VPU/EUP-only f32 math."""
    a1, a2, a3, a4, a5 = (0.254829592, -0.284496736, 1.421413741,
                          -1.453152027, 1.061405429)
    p = 0.3275911
    ax = jnp.abs(x)
    t = pl.reciprocal(1.0 + p * ax, approx=True)   # EUP slot instead of a VPU divide
    poly = ((((a5 * t + a4) * t + a3) * t + a2) * t + a1) * t
    y = 1.0 - poly * jnp.exp(-ax * ax)
    return jnp.where(x < 0.0, -y, y)


def _gelu_exact(x):
    # PyTorch F.gelu default: 0.5 * x * (1 + erf(x / sqrt(2)))
    return 0.5 * x * (1.0 + _erf_approx(x * _SQRT_HALF))


# ------------------------------ Pallas kernel --------------------------------
def _gated_gelu_ffn_kernel(x_ref, wi0_ref, wi1_ref, wo_ref, o_ref, acc_ref):
    f = pl.program_id(1)                       # d_ff reduction step (last grid axis)

    @pl.when(f == 0)
    def _():
        acc_ref[...] = jnp.zeros_like(acc_ref)

    x = x_ref[...]                                                          # (tm, D)
    h_lin = jnp.dot(x, wi0_ref[...], preferred_element_type=jnp.float32)    # (tm, tf) f32
    h_act = jnp.dot(x, wi1_ref[...], preferred_element_type=jnp.float32)    # (tm, tf) f32
    gated = h_lin * _gelu_exact(h_act)          # f32 gating (v5e has no bf16 VPU)
    # TODO(synk): dropout is inference-mode identity here; training-mode dropout would
    #             mask `gated` using pltpu.prng_seed / pltpu.prng_random_bits.
    acc_ref[...] += jnp.dot(gated.astype(wo_ref.dtype), wo_ref[...],
                            preferred_element_type=jnp.float32)             # (tm, D) f32

    @pl.when(f == pl.num_programs(1) - 1)
    def _():
        o_ref[...] = acc_ref[...].astype(o_ref.dtype)


# ------------------------------- wrapper --------------------------------------
def _round_up(x, m):
    return ((x + m - 1) // m) * m


def _cdiv(a, b):
    return (a + b - 1) // b


def _pick_token_tile(t):
    """Token tile: multiple of 8, <=512 rows; when there is enough work, make the tile
    count even so v7x's two TensorCores both get token tiles."""
    t8 = _round_up(t, 8)
    if t8 <= 256:
        return t8                                  # one small tile
    if t8 <= 1024:
        return _round_up(_cdiv(t8, 2), 8)          # exactly 2 tiles, minimal padding
    tiles = _cdiv(t8, 512)
    tiles += tiles % 2                             # even tile count
    return _round_up(_cdiv(t8, tiles), 8)


def _pick_ff_tile(d_ff):
    """d_ff reduction tile: full d_ff when small, otherwise a 128-multiple divisor."""
    if d_ff <= 1024:
        return d_ff
    for tf in (1024, 512, 256, 128):
        if d_ff % tf == 0:
            return tf
    return d_ff


def _build_ffn_call(t_pad, d_model, d_ff, tm, tf, out_dtype, compute_dtype,
                    single_buffer_weights):
    t_tiles = t_pad // tm
    f_tiles = d_ff // tf

    def w_spec(shape, index_map):
        if single_buffer_weights:
            # Constant index_map across the grid -> a second pipeline buffer is waste.
            return pl.BlockSpec(shape, index_map, pipeline_mode=pl.Buffered(1))
        return pl.BlockSpec(shape, index_map)

    csize = jnp.dtype(compute_dtype).itemsize
    osize = jnp.dtype(out_dtype).itemsize

    # Conservative VMEM plan (double-buffered everywhere) + headroom, clamped to
    # [32 MiB, 64 MiB] so the request is legal on every chip (v7x: 64 MiB physical).
    need = (2 * (2 * d_model * tf + tf * d_model) * csize   # wi0 + wi1 + wo buffers
            + 2 * tm * d_model * csize                       # x buffers
            + 2 * tm * d_model * osize                       # out buffers
            + tm * d_model * 4                               # f32 accumulator scratch
            + 3 * tm * tf * 4)                               # live (tm, tf) f32 temps
    vmem_limit = max(32 * 1024 * 1024, min(int(need * 1.5), 64 * 1024 * 1024))

    cost = pl.CostEstimate(
        flops=6 * t_pad * d_model * d_ff,                    # three matmuls
        transcendentals=t_pad * d_ff,                        # one exp per GELU element
        bytes_accessed=(t_pad * d_model * (csize + osize)
                        + 3 * d_model * d_ff * csize))

    return pl.pallas_call(
        _gated_gelu_ffn_kernel,
        out_shape=jax.ShapeDtypeStruct((t_pad, d_model), out_dtype),
        grid=(t_tiles, f_tiles),
        in_specs=[
            pl.BlockSpec((tm, d_model), lambda i, f: (i, 0)),   # token slab
            w_spec((d_model, tf), lambda i, f: (0, f)),         # wi_0 d_ff-slice
            w_spec((d_model, tf), lambda i, f: (0, f)),         # wi_1 d_ff-slice
            w_spec((tf, d_model), lambda i, f: (f, 0)),         # wo   d_ff-slice
        ],
        out_specs=pl.BlockSpec((tm, d_model), lambda i, f: (i, 0)),
        scratch_shapes=[pltpu.VMEM((tm, d_model), jnp.float32)],
        compiler_params=pltpu.CompilerParams(
            dimension_semantics=("parallel", "arbitrary"),
            vmem_limit_bytes=vmem_limit),
        cost_estimate=cost,
    )


def t5_dense_gated_gelu_dense(hidden_states, wi0, wi1, wo,
                              compute_dtype=jnp.bfloat16):
    """VIP5 T5DenseGatedGeluDense forward: (x@wi0) * gelu(x@wi1) @ wo.

    hidden_states: (..., d_model)
    wi0 / wi1    : (d_model, d_ff)  -- i.e. the transpose of nn.Linear.weight
    wo           : (d_ff, d_model)  -- i.e. the transpose of nn.Linear.weight
    compute_dtype: matmul-operand dtype (bf16 by default; accumulation is always f32).
    """
    orig_shape = hidden_states.shape
    out_dtype = hidden_states.dtype
    d_model = orig_shape[-1]
    d_ff = wi0.shape[1]

    x = hidden_states.reshape(-1, d_model)       # lane-dense token slab (T, D)
    t = x.shape[0]
    tm = _pick_token_tile(t)
    tf = _pick_ff_tile(d_ff)
    t_pad = _round_up(t, tm)
    f_tiles = d_ff // tf

    # Cast matmul operands once here (halves weight/activation HBM traffic vs f32).
    xc = x.astype(compute_dtype)
    wi0c = wi0.astype(compute_dtype)
    wi1c = wi1.astype(compute_dtype)
    woc = wo.astype(compute_dtype)
    if t_pad != t:
        # TODO(synk): a masked ragged last tile would avoid this extra HBM round trip.
        xc = jnp.pad(xc, ((0, t_pad - t), (0, 0)))

    single_buffer = f_tiles == 1            # weight index_maps are constant in that case
    try:
        out = _build_ffn_call(t_pad, d_model, d_ff, tm, tf, out_dtype,
                              compute_dtype, single_buffer)(xc, wi0c, wi1c, woc)
    except Exception:
        if not single_buffer:
            raise
        # This build rejected pl.Buffered(1); retry with default double buffering.
        out = _build_ffn_call(t_pad, d_model, d_ff, tm, tf, out_dtype,
                              compute_dtype, False)(xc, wi0c, wi1c, woc)

    if t_pad != t:
        out = out[:t]
    return out.reshape(orig_shape)


# --------------------------- pure-JAX reference --------------------------------
def t5_dense_gated_gelu_dense_ref(hidden_states, wi0, wi1, wo):
    hp = jax.lax.Precision.HIGHEST
    h_lin = jnp.einsum('...d,df->...f', hidden_states, wi0, precision=hp)
    h_act = jax.nn.gelu(
        jnp.einsum('...d,df->...f', hidden_states, wi1, precision=hp),
        approximate=False)                       # exact erf gelu == F.gelu default
    return jnp.einsum('...f,fd->...d', h_lin * h_act, wo, precision=hp)


# ------------------------------------ main -------------------------------------
if __name__ == "__main__":
    B, S, D_MODEL, D_FF = 2, 8, 128, 256   # small but lane-dense shapes

    key = jax.random.PRNGKey(0)
    k0, k1, k2, k3 = jax.random.split(key, 4)

    h = jax.random.normal(k0, (B, S, D_MODEL), dtype=jnp.float32)
    wi0 = 0.05 * jax.random.normal(k1, (D_MODEL, D_FF), dtype=jnp.float32)
    wi1 = 0.05 * jax.random.normal(k2, (D_MODEL, D_FF), dtype=jnp.float32)
    wo = 0.05 * jax.random.normal(k3, (D_FF, D_MODEL), dtype=jnp.float32)

    ref = jax.block_until_ready(t5_dense_gated_gelu_dense_ref(h, wi0, wi1, wo))

    # Default production path: bf16 matmul operands, f32 accumulation.
    out = jax.block_until_ready(t5_dense_gated_gelu_dense(h, wi0, wi1, wo))

    assert out.shape == h.shape and out.dtype == h.dtype
    max_diff = float(jnp.max(jnp.abs(out - ref)))
    # Tolerance reflects bf16 operands vs. the f32 HIGHEST-precision reference.
    assert max_diff < 2e-2, f"max abs diff {max_diff}"

    print("KERNEL_OK")
</pallas_src>

<mosaic_0001>
module attributes {stable_mosaic.version = 11 : i64} {
  func.func @_gated_gelu_ffn_kernel(%arg0: i32, %arg1: i32, %arg2: memref<16x128xbf16, #tpu.memory_space<vmem>>, %arg3: memref<128x256xbf16, #tpu.memory_space<vmem>>, %arg4: memref<128x256xbf16, #tpu.memory_space<vmem>>, %arg5: memref<256x128xbf16, #tpu.memory_space<vmem>>, %arg6: memref<16x128xf32, #tpu.memory_space<vmem>>, %arg7: memref<16x128xf32, #tpu.memory_space<vmem>>) attributes {dimension_semantics = [#tpu.dimension_semantics<parallel>, #tpu.dimension_semantics<arbitrary>], iteration_bounds = array<i64: 1, 1>, scalar_prefetch = 0 : i64, scratch_operands = 1 : i64, tpu.core_type = #tpu.core_type<tc>, window_params = [{transform_indices = @transform_0, window_bounds = array<i64: 16, 128>}, {pipeline_mode = #tpu.pipeline_mode<synchronous>, transform_indices = @transform_1, window_bounds = array<i64: 128, 256>}, {pipeline_mode = #tpu.pipeline_mode<synchronous>, transform_indices = @transform_2, window_bounds = array<i64: 128, 256>}, {pipeline_mode = #tpu.pipeline_mode<synchronous>, transform_indices = @transform_3, window_bounds = array<i64: 256, 128>}, {transform_indices = @transform_4, window_bounds = array<i64: 16, 128>}]} {
    %c0_i32 = arith.constant 0 : i32
    %0 = arith.cmpi eq, %arg1, %c0_i32 : i32
    %1 = arith.extui %0 : i1 to i32
    %c0_i32_0 = arith.constant 0 : i32
    %2 = arith.cmpi ne, %1, %c0_i32_0 : i32
    scf.if %2 {
      %cst_30 = arith.constant 0.000000e+00 : f32
      %57 = vector.broadcast %cst_30 : f32 to vector<16x128xf32>
      %c0_31 = arith.constant 0 : index
      %c0_32 = arith.constant 0 : index
      %58 = vector.load %arg7[%c0_31, %c0_32] : memref<16x128xf32, #tpu.memory_space<vmem>>, vector<16x128xf32>
      tpu.vector_store %arg7[%c0_31, %c0_32], %57 {strides = array<i32>} : memref<16x128xf32, #tpu.memory_space<vmem>>, vector<16x128xf32>,
    } else {
    }
    %c0 = arith.constant 0 : index
    %c0_1 = arith.constant 0 : index
    %3 = vector.load %arg2[%c0, %c0_1] : memref<16x128xbf16, #tpu.memory_space<vmem>>, vector<16x128xbf16>
    %c0_2 = arith.constant 0 : index
    %c0_3 = arith.constant 0 : index
    %4 = vector.load %arg3[%c0_2, %c0_3] : memref<128x256xbf16, #tpu.memory_space<vmem>>, vector<128x256xbf16>
    %cst = arith.constant dense<0.000000e+00> : vector<16x256xf32>
    %5 = tpu.matmul %3, %4, %cst {dimension_numbers = #tpu.dot_dimension_numbers<[1], [0], [0], [1], [0, 0, 1, 1], [], []>} : vector<16x128xbf16>, vector<128x256xbf16>, vector<16x256xf32> -> vector<16x256xf32>
    %c0_4 = arith.constant 0 : index
    %c0_5 = arith.constant 0 : index
    %6 = vector.load %arg4[%c0_4, %c0_5] : memref<128x256xbf16, #tpu.memory_space<vmem>>, vector<128x256xbf16>
    %cst_6 = arith.constant dense<0.000000e+00> : vector<16x256xf32>
    %7 = tpu.matmul %3, %6, %cst_6 {dimension_numbers = #tpu.dot_dimension_numbers<[1], [0], [0], [1], [0, 0, 1, 1], [], []>} : vector<16x128xbf16>, vector<128x256xbf16>, vector<16x256xf32> -> vector<16x256xf32>
    %cst_7 = arith.constant 5.000000e-01 : f32
    %8 = vector.broadcast %cst_7 : f32 to vector<16x256xf32>
    %9 = arith.mulf %8, %7 : vector<16x256xf32>
    %cst_8 = arith.constant 0.707106769 : f32
    %10 = vector.broadcast %cst_8 : f32 to vector<16x256xf32>
    %11 = arith.mulf %7, %10 : vector<16x256xf32>
    %12 = math.absf %11 : vector<16x256xf32>
    %cst_9 = arith.constant 0.327591091 : f32
    %13 = vector.broadcast %cst_9 : f32 to vector<16x256xf32>
    %14 = arith.mulf %13, %12 : vector<16x256xf32>
    %cst_10 = arith.constant 1.000000e+00 : f32
    %15 = vector.broadcast %cst_10 : f32 to vector<16x256xf32>
    %16 = arith.addf %15, %14 : vector<16x256xf32>
    %17 = tpu.reciprocal %16 {approx = true} : vector<16x256xf32> -> vector<16x256xf32>
    %cst_11 = arith.constant 1.06140542 : f32
    %18 = vector.broadcast %cst_11 : f32 to vector<16x256xf32>
    %19 = arith.mulf %18, %17 : vector<16x256xf32>
    %cst_12 = arith.constant -1.45315206 : f32
    %20 = vector.broadcast %cst_12 : f32 to vector<16x256xf32>
    %21 = arith.addf %19, %20 : vector<16x256xf32>
    %22 = arith.mulf %21, %17 : vector<16x256xf32>
    %cst_13 = arith.constant 1.42141378 : f32
    %23 = vector.broadcast %cst_13 : f32 to vector<16x256xf32>
    %24 = arith.addf %22, %23 : vector<16x256xf32>
    %25 = arith.mulf %24, %17 : vector<16x256xf32>
    %cst_14 = arith.constant -0.284496725 : f32
    %26 = vector.broadcast %cst_14 : f32 to vector<16x256xf32>
    %27 = arith.addf %25, %26 : vector<16x256xf32>
    %28 = arith.mulf %27, %17 : vector<16x256xf32>
    %cst_15 = arith.constant 0.254829586 : f32
    %29 = vector.broadcast %cst_15 : f32 to vector<16x256xf32>
    %30 = arith.addf %28, %29 : vector<16x256xf32>
    %31 = arith.mulf %30, %17 : vector<16x256xf32>
    %cst_16 = arith.constant 0.000000e+00 : f32
    %32 = vector.broadcast %cst_16 : f32 to vector<16x256xf32>
    %33 = arith.subf %32, %12 : vector<16x256xf32>
    %34 = arith.mulf %33, %12 : vector<16x256xf32>
    %35 = math.exp %34 : vector<16x256xf32>
    %36 = arith.mulf %31, %35 : vector<16x256xf32>
    %cst_17 = arith.constant 1.000000e+00 : f32
    %37 = vector.broadcast %cst_17 : f32 to vector<16x256xf32>
    %38 = arith.subf %37, %36 : vector<16x256xf32>
    %cst_18 = arith.constant 0.000000e+00 : f32
    %39 = vector.broadcast %cst_18 : f32 to vector<16x256xf32>
    %40 = arith.cmpf olt, %11, %39 : vector<16x256xf32>
    %cst_19 = arith.constant 0.000000e+00 : f32
    %41 = vector.broadcast %cst_19 : f32 to vector<16x256xf32>
    %42 = arith.subf %41, %38 : vector<16x256xf32>
    %43 = arith.select %40, %42, %38 : vector<16x256xi1>, vector<16x256xf32>
    %cst_20 = arith.constant 1.000000e+00 : f32
    %44 = vector.broadcast %cst_20 : f32 to vector<16x256xf32>
    %45 = arith.addf %44, %43 : vector<16x256xf32>
    %46 = arith.mulf %9, %45 : vector<16x256xf32>
    %47 = arith.mulf %5, %46 : vector<16x256xf32>
    %c0_21 = arith.constant 0 : index
    %c0_22 = arith.constant 0 : index
    %48 = vector.load %arg7[%c0_21, %c0_22] : memref<16x128xf32, #tpu.memory_space<vmem>>, vector<16x128xf32>
    %49 = arith.truncf %47 : vector<16x256xf32> to vector<16x256xbf16>
    %c0_23 = arith.constant 0 : index
    %c0_24 = arith.constant 0 : index
    %50 = vector.load %arg5[%c0_23, %c0_24] : memref<256x128xbf16, #tpu.memory_space<vmem>>, vector<256x128xbf16>
    %cst_25 = arith.constant dense<0.000000e+00> : vector<16x128xf32>
    %51 = tpu.matmul %49, %50, %cst_25 {dimension_numbers = #tpu.dot_dimension_numbers<[1], [0], [0], [1], [0, 0, 1, 1], [], []>} : vector<16x256xbf16>, vector<256x128xbf16>, vector<16x128xf32> -> vector<16x128xf32>
    %52 = arith.addf %48, %51 : vector<16x128xf32>
    %c0_26 = arith.constant 0 : index
    %c0_27 = arith.constant 0 : index
    %53 = vector.load %arg7[%c0_26, %c0_27] : memref<16x128xf32, #tpu.memory_space<vmem>>, vector<16x128xf32>
    tpu.vector_store %arg7[%c0_26, %c0_27], %52 {strides = array<i32>} : memref<16x128xf32, #tpu.memory_space<vmem>>, vector<16x128xf32>,
    %c0_i32_28 = arith.constant 0 : i32
    %54 = arith.cmpi eq, %arg1, %c0_i32_28 : i32
    %55 = arith.extui %54 : i1 to i32
    %c0_i32_29 = arith.constant 0 : i32
    %56 = arith.cmpi ne, %55, %c0_i32_29 : i32
    scf.if %56 {
      %c0_30 = arith.constant 0 : index
      %c0_31 = arith.constant 0 : index
      %57 = vector.load %arg7[%c0_30, %c0_31] : memref<16x128xf32, #tpu.memory_space<vmem>>, vector<16x128xf32>
      %c0_32 = arith.constant 0 : index
      %c0_33 = arith.constant 0 : index
      %58 = vector.load %arg6[%c0_32, %c0_33] : memref<16x128xf32, #tpu.memory_space<vmem>>, vector<16x128xf32>
      tpu.vector_store %arg6[%c0_32, %c0_33], %57 {strides = array<i32>} : memref<16x128xf32, #tpu.memory_space<vmem>>, vector<16x128xf32>,
    } else {
    }
    return
  }
  func.func @transform_0(%arg0: i32, %arg1: i32) -> (i32, i32) {
    %c0_i32 = arith.constant 0 : i32
    %c0_i32_0 = arith.constant 0 : i32
    return %arg0, %c0_i32 : i32, i32
  }
  func.func @transform_1(%arg0: i32, %arg1: i32) -> (i32, i32) {
    %c0_i32 = arith.constant 0 : i32
    %c0_i32_0 = arith.constant 0 : i32
    return %c0_i32, %arg1 : i32, i32
  }
  func.func @transform_2(%arg0: i32, %arg1: i32) -> (i32, i32) {
    %c0_i32 = arith.constant 0 : i32
    %c0_i32_0 = arith.constant 0 : i32
    return %c0_i32, %arg1 : i32, i32
  }
  func.func @transform_3(%arg0: i32, %arg1: i32) -> (i32, i32) {
    %c0_i32 = arith.constant 0 : i32
    %c0_i32_0 = arith.constant 0 : i32
    return %arg1, %c0_i32 : i32, i32
  }
  func.func @transform_4(%arg0: i32, %arg1: i32) -> (i32, i32) {
    %c0_i32 = arith.constant 0 : i32
    %c0_i32_0 = arith.constant 0 : i32
    return %arg0, %c0_i32 : i32, i32
  }
}

module attributes {stable_mosaic.version = 11 : i64} {
  func.func @_gated_gelu_ffn_kernel(%arg0: i32, %arg1: i32, %arg2: memref<16x128xbf16, #tpu.memory_space<vmem>>, %arg3: memref<128x256xbf16, #tpu.memory_space<vmem>>, %arg4: memref<128x256xbf16, #tpu.memory_space<vmem>>, %arg5: memref<256x128xbf16, #tpu.memory_space<vmem>>, %arg6: memref<16x128xf32, #tpu.memory_space<vmem>>, %arg7: memref<16x128xf32, #tpu.memory_space<vmem>>) attributes {dimension_semantics = [#tpu.dimension_semantics<parallel>, #tpu.dimension_semantics<arbitrary>], iteration_bounds = array<i64: 1, 1>, scalar_prefetch = 0 : i64, scratch_operands = 1 : i64, tpu.core_type = #tpu.core_type<tc>, window_params = [{transform_indices = @transform_0, window_bounds = array<i64: 16, 128>}, {transform_indices = @transform_1, window_bounds = array<i64: 128, 256>}, {transform_indices = @transform_2, window_bounds = array<i64: 128, 256>}, {transform_indices = @transform_3, window_bounds = array<i64: 256, 128>}, {transform_indices = @transform_4, window_bounds = array<i64: 16, 128>}]} {
    %c0_i32 = arith.constant 0 : i32
    %0 = arith.cmpi eq, %arg1, %c0_i32 : i32
    %1 = arith.extui %0 : i1 to i32
    %c0_i32_0 = arith.constant 0 : i32
    %2 = arith.cmpi ne, %1, %c0_i32_0 : i32
    scf.if %2 {
      %cst_30 = arith.constant 0.000000e+00 : f32
      %57 = vector.broadcast %cst_30 : f32 to vector<16x128xf32>
      %c0_31 = arith.constant 0 : index
      %c0_32 = arith.constant 0 : index
      %58 = vector.load %arg7[%c0_31, %c0_32] : memref<16x128xf32, #tpu.memory_space<vmem>>, vector<16x128xf32>
      tpu.vector_store %arg7[%c0_31, %c0_32], %57 {strides = array<i32>} : memref<16x128xf32, #tpu.memory_space<vmem>>, vector<16x128xf32>,
    } else {
    }
    %c0 = arith.constant 0 : index
    %c0_1 = arith.constant 0 : index
    %3 = vector.load %arg2[%c0, %c0_1] : memref<16x128xbf16, #tpu.memory_space<vmem>>, vector<16x128xbf16>
    %c0_2 = arith.constant 0 : index
    %c0_3 = arith.constant 0 : index
    %4 = vector.load %arg3[%c0_2, %c0_3] : memref<128x256xbf16, #tpu.memory_space<vmem>>, vector<128x256xbf16>
    %cst = arith.constant dense<0.000000e+00> : vector<16x256xf32>
    %5 = tpu.matmul %3, %4, %cst {dimension_numbers = #tpu.dot_dimension_numbers<[1], [0], [0], [1], [0, 0, 1, 1], [], []>} : vector<16x128xbf16>, vector<128x256xbf16>, vector<16x256xf32> -> vector<16x256xf32>
    %c0_4 = arith.constant 0 : index
    %c0_5 = arith.constant 0 : index
    %6 = vector.load %arg4[%c0_4, %c0_5] : memref<128x256xbf16, #tpu.memory_space<vmem>>, vector<128x256xbf16>
    %cst_6 = arith.constant dense<0.000000e+00> : vector<16x256xf32>
    %7 = tpu.matmul %3, %6, %cst_6 {dimension_numbers = #tpu.dot_dimension_numbers<[1], [0], [0], [1], [0, 0, 1, 1], [], []>} : vector<16x128xbf16>, vector<128x256xbf16>, vector<16x256xf32> -> vector<16x256xf32>
    %cst_7 = arith.constant 5.000000e-01 : f32
    %8 = vector.broadcast %cst_7 : f32 to vector<16x256xf32>
    %9 = arith.mulf %8, %7 : vector<16x256xf32>
    %cst_8 = arith.constant 0.707106769 : f32
    %10 = vector.broadcast %cst_8 : f32 to vector<16x256xf32>
    %11 = arith.mulf %7, %10 : vector<16x256xf32>
    %12 = math.absf %11 : vector<16x256xf32>
    %cst_9 = arith.constant 0.327591091 : f32
    %13 = vector.broadcast %cst_9 : f32 to vector<16x256xf32>
    %14 = arith.mulf %13, %12 : vector<16x256xf32>
    %cst_10 = arith.constant 1.000000e+00 : f32
    %15 = vector.broadcast %cst_10 : f32 to vector<16x256xf32>
    %16 = arith.addf %15, %14 : vector<16x256xf32>
    %17 = tpu.reciprocal %16 {approx = true} : vector<16x256xf32> -> vector<16x256xf32>
    %cst_11 = arith.constant 1.06140542 : f32
    %18 = vector.broadcast %cst_11 : f32 to vector<16x256xf32>
    %19 = arith.mulf %18, %17 : vector<16x256xf32>
    %cst_12 = arith.constant -1.45315206 : f32
    %20 = vector.broadcast %cst_12 : f32 to vector<16x256xf32>
    %21 = arith.addf %19, %20 : vector<16x256xf32>
    %22 = arith.mulf %21, %17 : vector<16x256xf32>
    %cst_13 = arith.constant 1.42141378 : f32
    %23 = vector.broadcast %cst_13 : f32 to vector<16x256xf32>
    %24 = arith.addf %22, %23 : vector<16x256xf32>
    %25 = arith.mulf %24, %17 : vector<16x256xf32>
    %cst_14 = arith.constant -0.284496725 : f32
    %26 = vector.broadcast %cst_14 : f32 to vector<16x256xf32>
    %27 = arith.addf %25, %26 : vector<16x256xf32>
    %28 = arith.mulf %27, %17 : vector<16x256xf32>
    %cst_15 = arith.constant 0.254829586 : f32
    %29 = vector.broadcast %cst_15 : f32 to vector<16x256xf32>
    %30 = arith.addf %28, %29 : vector<16x256xf32>
    %31 = arith.mulf %30, %17 : vector<16x256xf32>
    %cst_16 = arith.constant 0.000000e+00 : f32
    %32 = vector.broadcast %cst_16 : f32 to vector<16x256xf32>
    %33 = arith.subf %32, %12 : vector<16x256xf32>
    %34 = arith.mulf %33, %12 : vector<16x256xf32>
    %35 = math.exp %34 : vector<16x256xf32>
    %36 = arith.mulf %31, %35 : vector<16x256xf32>
    %cst_17 = arith.constant 1.000000e+00 : f32
    %37 = vector.broadcast %cst_17 : f32 to vector<16x256xf32>
    %38 = arith.subf %37, %36 : vector<16x256xf32>
    %cst_18 = arith.constant 0.000000e+00 : f32
    %39 = vector.broadcast %cst_18 : f32 to vector<16x256xf32>
    %40 = arith.cmpf olt, %11, %39 : vector<16x256xf32>
    %cst_19 = arith.constant 0.000000e+00 : f32
    %41 = vector.broadcast %cst_19 : f32 to vector<16x256xf32>
    %42 = arith.subf %41, %38 : vector<16x256xf32>
    %43 = arith.select %40, %42, %38 : vector<16x256xi1>, vector<16x256xf32>
    %cst_20 = arith.constant 1.000000e+00 : f32
    %44 = vector.broadcast %cst_20 : f32 to vector<16x256xf32>
    %45 = arith.addf %44, %43 : vector<16x256xf32>
    %46 = arith.mulf %9, %45 : vector<16x256xf32>
    %47 = arith.mulf %5, %46 : vector<16x256xf32>
    %c0_21 = arith.constant 0 : index
    %c0_22 = arith.constant 0 : index
    %48 = vector.load %arg7[%c0_21, %c0_22] : memref<16x128xf32, #tpu.memory_space<vmem>>, vector<16x128xf32>
    %49 = arith.truncf %47 : vector<16x256xf32> to vector<16x256xbf16>
    %c0_23 = arith.constant 0 : index
    %c0_24 = arith.constant 0 : index
    %50 = vector.load %arg5[%c0_23, %c0_24] : memref<256x128xbf16, #tpu.memory_space<vmem>>, vector<256x128xbf16>
    %cst_25 = arith.constant dense<0.000000e+00> : vector<16x128xf32>
    %51 = tpu.matmul %49, %50, %cst_25 {dimension_numbers = #tpu.dot_dimension_numbers<[1], [0], [0], [1], [0, 0, 1, 1], [], []>} : vector<16x256xbf16>, vector<256x128xbf16>, vector<16x128xf32> -> vector<16x128xf32>
    %52 = arith.addf %48, %51 : vector<16x128xf32>
    %c0_26 = arith.constant 0 : index
    %c0_27 = arith.constant 0 : index
    %53 = vector.load %arg7[%c0_26, %c0_27] : memref<16x128xf32, #tpu.memory_space<vmem>>, vector<16x128xf32>
    tpu.vector_store %arg7[%c0_26, %c0_27], %52 {strides = array<i32>} : memref<16x128xf32, #tpu.memory_space<vmem>>, vector<16x128xf32>,
    %c0_i32_28 = arith.constant 0 : i32
    %54 = arith.cmpi eq, %arg1, %c0_i32_28 : i32
    %55 = arith.extui %54 : i1 to i32
    %c0_i32_29 = arith.constant 0 : i32
    %56 = arith.cmpi ne, %55, %c0_i32_29 : i32
    scf.if %56 {
      %c0_30 = arith.constant 0 : index
      %c0_31 = arith.constant 0 : index
      %57 = vector.load %arg7[%c0_30, %c0_31] : memref<16x128xf32, #tpu.memory_space<vmem>>, vector<16x128xf32>
      %c0_32 = arith.constant 0 : index
      %c0_33 = arith.constant 0 : index
      %58 = vector.load %arg6[%c0_32, %c0_33] : memref<16x128xf32, #tpu.memory_space<vmem>>, vector<16x128xf32>
      tpu.vector_store %arg6[%c0_32, %c0_33], %57 {strides = array<i32>} : memref<16x128xf32, #tpu.memory_space<vmem>>, vector<16x128xf32>,
    } else {
    }
    return
  }
  func.func @transform_0(%arg0: i32, %arg1: i32) -> (i32, i32) {
    %c0_i32 = arith.constant 0 : i32
    %c0_i32_0 = arith.constant 0 : i32
    return %arg0, %c0_i32 : i32, i32
  }
  func.func @transform_1(%arg0: i32, %arg1: i32) -> (i32, i32) {
    %c0_i32 = arith.constant 0 : i32
    %c0_i32_0 = arith.constant 0 : i32
    return %c0_i32, %arg1 : i32, i32
  }
  func.func @transform_2(%arg0: i32, %arg1: i32) -> (i32, i32) {
    %c0_i32 = arith.constant 0 : i32
    %c0_i32_0 = arith.constant 0 : i32
    return %c0_i32, %arg1 : i32, i32
  }
  func.func @transform_3(%arg0: i32, %arg1: i32) -> (i32, i32) {
    %c0_i32 = arith.constant 0 : i32
    %c0_i32_0 = arith.constant 0 : i32
    return %arg1, %c0_i32 : i32, i32
  }
  func.func @transform_4(%arg0: i32, %arg1: i32) -> (i32, i32) {
    %c0_i32 = arith.constant 0 : i32
    %c0_i32_0 = arith.constant 0 : i32
    return %arg0, %c0_i32 : i32, i32
  }
}

</mosaic_0001>

<bundles_post_ra>
// kernel: tpu_custom_call.1
= control target key start
LH: loop header
LB: loop body
LE: loop exit
PB: predicated region body
PF: predicated region fallthrough
CT: control target
= control target key end

     0   :  { %9 = vsyncpa [#allocation4], 0  ;;  %s1118_s0 = inlined_call_operand.hbm [shape: bf16[16,128], index: 0, kind: input, shape index: {}]   ;;  %s1119_s1 = inlined_call_operand.hbm [shape: bf16[128,256], index: 1, kind: input, shape index: {}]   ;;  %s1120_s2 = inlined_call_operand.hbm [shape: bf16[128,256], index: 2, kind: input, shape index: {}]   ;;  %s1121_s3 = inlined_call_operand.hbm [shape: bf16[256,128], index: 3, kind: input, shape index: {}]   ;;  %s1122_s4 = inlined_call_operand.hbm [shape: f32[16,128], index: 4, kind: output, shape index: {}]  }
   0x1   :  { %10 = vsyncpa [#allocation7], 0 }
   0x2   :  { %11 = vsyncpa [#allocation10], 0 }
   0x3   :  { %12 = vsyncpa [#allocation5], 0  ;;  %s957_s15 = smov [#allocation6]   ;;  %s839_s19 = scalar_lea.hbm %s1119_s1, 2048 }
   0x4   :  { %s30_s16 = sshll.u32 %s957_s15, 4  ;;  %p840_p0 = scmp.ne.s32.totalorder %s1119_s1, %s839_s19  ;;  %s31_s16 = int_to_ptr.vmem [resolvable:$true] %s30_s16 }
   0x5   :  { %p843_p1 = scmp.lt.u32.totalorder %s839_s19, %s1119_s1 }
   0x7   :  { %p845_p2 = pnand %p843_p1, %p840_p0 }
   0x9   :  { %848 = shalt.err (!%p845_p2)
}
   0xa   :  { %s849_s24 = scalar_lea.vmem %s31_s16, 2048  ;;  %p854_p4 = scmp.lt.s32.totalorder %s31_s16, %s31_s16 }
   0xb   :  { %p850_p3 = scmp.ne.s32.totalorder %s31_s16, %s849_s24  ;;  %p855_p5 = scmp.lt.s32.totalorder %s849_s24, %s849_s24 }
   0xd   :  { %p856_p6 = por %p855_p5, %p854_p4 }
   0xf   :  { %p857_p7 = pnand %p856_p6, %p850_p3 }
  0x11   :  { %860 = shalt.err (!%p857_p7)
}
  0x12   :  { %s958_s25 = smov 128   ;;  %s959_s26 = smov 8  }
  0x13   :  { %36 = dma.hbm_to_vmem [thread:$0]  %s1119_s1, 2048, %s31_s16, [#allocation7], %s958_s25, %s958_s25, %s959_s26  }
  0x14   :  { %s960_s29 = smov [#allocation3]   ;;  %s861_s7 = scalar_lea.hbm %s1118_s0, 128 }
  0x15   :  { %s18_s30 = sshll.u32 %s960_s29, 4  ;;  %p862_p8 = scmp.ne.s32.totalorder %s1118_s0, %s861_s7  ;;  %s19_s30 = int_to_ptr.vmem [resolvable:$true] %s18_s30 }
  0x16   :  { %p865_p9 = scmp.lt.u32.totalorder %s861_s7, %s1118_s0 }
  0x18   :  { %p867_p10 = pnand %p865_p9, %p862_p8 }
  0x1a   :  { %870 = shalt.err (!%p867_p10)
}
  0x1b   :  { %s871_s12 = scalar_lea.vmem %s19_s30, 128  ;;  %p876_p12 = scmp.lt.s32.totalorder %s19_s30, %s19_s30 }
  0x1c   :  { %p872_p11 = scmp.ne.s32.totalorder %s19_s30, %s871_s12  ;;  %p877_p13 = scmp.lt.s32.totalorder %s871_s12, %s871_s12 }
  0x1e   :  { %p878_p0 = por %p877_p13, %p876_p12 }
  0x20   :  { %p879_p1 = pnand %p878_p0, %p872_p11 }
  0x22   :  { %882 = shalt.err (!%p879_p1)
}
  0x23   :  { %s961_s1 = smov 64   ;;  %s962_s13 = smov 4  }
  0x24   :  { %24 = dma.hbm_to_vmem [thread:$0]  %s1118_s0, 128, %s19_s30, [#allocation4], %s961_s1, %s961_s1, %s962_s13  }
  0x25   :  { %s963_s16 = smov [#allocation8]   ;;  %s964_s18 = smov [#allocation9]  }
  0x26   :  { %s42_s17 = sshll.u32 %s963_s16, 4  ;;  %s54_s19 = sshll.u32 %s964_s18, 4  ;;  %s43_s17 = int_to_ptr.vmem [resolvable:$true] %s42_s17  ;;  %s1022_s19 = int_to_ptr.vmem [resolvable:$true] %s54_s19 }
  0x27   :  { %s883_s22 = scalar_lea.hbm %s1120_s2, 2048 }
  0x28   :  { %p884_p2 = scmp.ne.s32.totalorder %s1120_s2, %s883_s22  ;;  %p887_p3 = scmp.lt.u32.totalorder %s883_s22, %s1120_s2 }
  0x2a   :  { %p889_p4 = pnand %p887_p3, %p884_p2 }
  0x2c   :  { %892 = shalt.err (!%p889_p4)
}
  0x2d   :  { %s893_s0 = scalar_lea.vmem %s43_s17, 2048  ;;  %p898_p6 = scmp.lt.s32.totalorder %s43_s17, %s43_s17 }
  0x2e   :  { %p894_p5 = scmp.ne.s32.totalorder %s43_s17, %s893_s0  ;;  %p899_p7 = scmp.lt.s32.totalorder %s893_s0, %s893_s0 }
  0x30   :  { %p900_p8 = por %p899_p7, %p898_p6 }
  0x32   :  { %p901_p9 = pnand %p900_p8, %p894_p5 }
  0x34   :  { %904 = shalt.err (!%p901_p9)
}
  0x35   :  { %48 = dma.hbm_to_vmem [thread:$0]  %s1120_s2, 2048, %s43_s17, [#allocation7], %s958_s25, %s958_s25, %s959_s26  }
  0x36   :  { %s905_s7 = scalar_lea.hbm %s1121_s3, 2048 }
  0x37   :  { %p906_p10 = scmp.ne.s32.totalorder %s1121_s3, %s905_s7  ;;  %p909_p11 = scmp.lt.u32.totalorder %s905_s7, %s1121_s3 }
  0x39   :  { %p911_p12 = pnand %p909_p11, %p906_p10 }
  0x3b   :  { %914 = shalt.err (!%p911_p12)
}
  0x3c   :  { %s915_s12 = scalar_lea.vmem %s1022_s19, 2048  ;;  %p920_p0 = scmp.lt.s32.totalorder %s1022_s19, %s1022_s19 }
  0x3d   :  { %p916_p13 = scmp.ne.s32.totalorder %s1022_s19, %s915_s12  ;;  %p921_p1 = scmp.lt.s32.totalorder %s915_s12, %s915_s12 }
  0x3f   :  { %p922_p2 = por %p921_p1, %p920_p0 }
  0x41   :  { %p923_p3 = pnand %p922_p2, %p916_p13 }
  0x43   :  { %926 = shalt.err (!%p923_p3)
}
  0x44   :  { %60 = dma.hbm_to_vmem [thread:$0]  %s1121_s3, 2048, %s1022_s19, [#allocation10], %s961_s1, %s961_s1, %s962_s13  }
  0x45   :  { %949 = dma.done.wait [#allocation4], 128  }
  0x46   :  { %950 = vsyncadd [#allocation4], 4294967168 }
  0x47   :  { %951 = dma.done.wait [#allocation7], 4096  }
  0x48   :  { %952 = vsyncadd [#allocation7], 4294963200 }
  0x49   :  { %953 = dma.done.wait [#allocation10], 2048  }
  0x4a   :  { %954 = vsyncadd [#allocation10], 4294965248  ;;  %v965_v0 = vmov 0   ;;  %v758_v1 = vld [vmem:[#allocation8 + $0x4] ss:$8 sps:$4 sm:$0xff]   ;;  %v782_v28 = vld [vmem:[#allocation3] sm:$0xff]  }
  0x4b   :  { %355 = vmatprep.mubr.bf16.mxu1 %v965_v0  ;;  %216 = vmatprep.mubr.bf16.mxu0 %v965_v0  ;;  %v760_v2 = vld [vmem:[#allocation8] ss:$8 sps:$4 sm:$0xff]   ;;  %v761_v3 = vld [vmem:[#allocation8 + $0x14] ss:$8 sps:$4 sm:$0xff]   ;;  %v763_v4 = vld [vmem:[#allocation8 + $0x10] ss:$8 sps:$4 sm:$0xff]  }
  0x4c   :  { %323 = vmatprep.subr.bf16.mxu1 %v758_v1  ;;  %v764_v5 = vld [vmem:[#allocation8 + $0x24] ss:$8 sps:$4 sm:$0xff]   ;;  %v766_v6 = vld [vmem:[#allocation8 + $0x20] ss:$8 sps:$4 sm:$0xff]   ;;  %v767_v7 = vld [vmem:[#allocation8 + $0x34] ss:$8 sps:$4 sm:$0xff]  }
  0x4d   :  { %324 = vmatpush1.bf16.msra.mxu1 %v760_v2  ;;  %v769_v8 = vld [vmem:[#allocation8 + $0x30] ss:$8 sps:$4 sm:$0xff]   ;;  %v770_v9 = vld [vmem:[#allocation8 + $0x44] ss:$8 sps:$4 sm:$0xff]   ;;  %v785_v11 = vld [vmem:[#allocation6] ss:$8 sps:$4 sm:$0xff]  }
  0x4e   :  { %325 = vmatprep.subr.bf16.mxu1 %v761_v3  ;;  %v783_v10 = vld [vmem:[#allocation6 + $0x4] ss:$8 sps:$4 sm:$0xff]   ;;  %v786_v12 = vld [vmem:[#allocation6 + $0x14] ss:$8 sps:$4 sm:$0xff]   ;;  %v772_v13 = vld [vmem:[#allocation8 + $0x40] ss:$8 sps:$4 sm:$0xff]  }
  0x4f   :  { %184 = vmatprep.subr.bf16.mxu0 %v783_v10  ;;  %v788_v14 = vld [vmem:[#allocation6 + $0x10] ss:$8 sps:$4 sm:$0xff]   ;;  %v773_v15 = vld [vmem:[#allocation8 + $0x54] ss:$8 sps:$4 sm:$0xff]   ;;  %v789_v16 = vld [vmem:[#allocation6 + $0x24] ss:$8 sps:$4 sm:$0xff]  }
  0x50   :  { %185 = vmatpush1.bf16.msra.mxu0 %v785_v11  ;;  %v775_v17 = vld [vmem:[#allocation8 + $0x50] ss:$8 sps:$4 sm:$0xff]   ;;  %v791_v18 = vld [vmem:[#allocation6 + $0x20] ss:$8 sps:$4 sm:$0xff]   ;;  %v776_v19 = vld [vmem:[#allocation8 + $0x64] ss:$8 sps:$4 sm:$0xff]  }
  0x51   :  { %326 = vmatpush1.bf16.msra.mxu1 %v763_v4  ;;  %186 = vmatprep.subr.bf16.mxu0 %v786_v12  ;;  %v792_v20 = vld [vmem:[#allocation6 + $0x34] ss:$8 sps:$4 sm:$0xff]   ;;  %v778_v21 = vld [vmem:[#allocation8 + $0x60] ss:$8 sps:$4 sm:$0xff]   ;;  %v794_v22 = vld [vmem:[#allocation6 + $0x30] ss:$8 sps:$4 sm:$0xff]  }
  0x52   :  { %327 = vmatprep.subr.bf16.mxu1 %v764_v5  ;;  %v779_v23 = vld [vmem:[#allocation8 + $0x74] ss:$8 sps:$4 sm:$0xff]   ;;  %v795_v24 = vld [vmem:[#allocation6 + $0x44] ss:$8 sps:$4 sm:$0xff]   ;;  %v781_v25 = vld [vmem:[#allocation8 + $0x70] ss:$8 sps:$4 sm:$0xff]  }
  0x53   :  { %v797_v26 = vld [vmem:[#allocation6 + $0x40] ss:$8 sps:$4 sm:$0xff]   ;;  %v798_v27 = vld [vmem:[#allocation6 + $0x54] ss:$8 sps:$4 sm:$0xff]   ;;  %v800_v29 = vld [vmem:[#allocation6 + $0x50] ss:$8 sps:$4 sm:$0xff]  }
  0x54   :  { %187 = vmatpush1.bf16.msra.mxu0 %v788_v14  ;;  %v801_v30 = vld [vmem:[#allocation6 + $0x64] ss:$8 sps:$4 sm:$0xff]   ;;  %v803_v31 = vld [vmem:[#allocation6 + $0x60] ss:$8 sps:$4 sm:$0xff]   ;;  %v804_v32 = vld [vmem:[#allocation6 + $0x74] ss:$8 sps:$4 sm:$0xff]  }
  0x55   :  { %328 = vmatpush1.bf16.msra.mxu1 %v766_v6  ;;  %188 = vmatprep.subr.bf16.mxu0 %v789_v16  ;;  %v806_v33 = vld [vmem:[#allocation6 + $0x70] ss:$8 sps:$4 sm:$0xff]   ;;  %v807_v34 = vld [vmem:[#allocation9 + $0x40] sm:$0xff]   ;;  %v809_v36 = vld [vmem:[#allocation9 + $0x48] sm:$0xff]   ;;  %s966_s3 = smov [#allocation11]  }
  0x56   :  { %329 = vmatprep.subr.bf16.mxu1 %v767_v7  ;;  %v808_v35 = vld [vmem:[#allocation9] sm:$0xff]   ;;  %v810_v37 = vld [vmem:[#allocation9 + $0x8] sm:$0xff]   ;;  %v811_v38 = vld [vmem:[#allocation9 + $0x50] sm:$0xff]   ;;  %s663_s1 = sshll.u32 %s966_s3, 4  ;;  %s664_s1 = int_to_ptr.vmem [resolvable:$true] %s663_s1 }
  0x57   :  { %v812_v39 = vld [vmem:[#allocation9 + $0x10] sm:$0xff]   ;;  %v813_v40 = vld [vmem:[#allocation9 + $0x58] sm:$0xff]   ;;  %v815_v42 = vld [vmem:[#allocation9 + $0x60] sm:$0xff]   ;;  %s927_s13 = scalar_lea.vmem %s664_s1, 256  ;;  %p932_p5 = scmp.lt.s32.totalorder %s664_s1, %s664_s1 }
  0x58   :  { %189 = vmatpush1.bf16.msra.mxu0 %v791_v18  ;;  %v814_v41 = vld [vmem:[#allocation9 + $0x18] sm:$0xff]   ;;  %v816_v43 = vld [vmem:[#allocation9 + $0x20] sm:$0xff]   ;;  %v817_v44 = vld [vmem:[#allocation9 + $0x68] sm:$0xff]   ;;  %p928_p4 = scmp.ne.s32.totalorder %s664_s1, %s927_s13  ;;  %p933_p6 = scmp.lt.s32.totalorder %s927_s13, %s927_s13 }
  0x59   :  { %330 = vmatpush1.bf16.msra.mxu1 %v769_v8  ;;  %190 = vmatprep.subr.bf16.mxu0 %v792_v20  ;;  %v818_v45 = vld [vmem:[#allocation9 + $0x28] sm:$0xff]   ;;  %v819_v46 = vld [vmem:[#allocation9 + $0x70] sm:$0xff]   ;;  %v821_v48 = vld [vmem:[#allocation9 + $0x78] sm:$0xff]  }
  0x5a   :  { %331 = vmatprep.subr.bf16.mxu1 %v770_v9  ;;  %v820_v47 = vld [vmem:[#allocation9 + $0x30] sm:$0xff]   ;;  %v822_v49 = vld [vmem:[#allocation9 + $0x38] sm:$0xff]   ;;  %p934_p7 = por %p933_p6, %p932_p5 }
  0x5c   :  { %191 = vmatpush1.bf16.msra.mxu0 %v794_v22  ;;  %p935_p8 = pnand %p934_p7, %p928_p4 }
  0x5d   :  { %332 = vmatpush1.bf16.msra.mxu1 %v772_v13  ;;  %192 = vmatprep.subr.bf16.mxu0 %v795_v24 }
  0x5e   :  { %333 = vmatprep.subr.bf16.mxu1 %v773_v15 }
  0x60   :  { %193 = vmatpush1.bf16.msra.mxu0 %v797_v26 }
  0x61   :  { %334 = vmatpush1.bf16.msra.mxu1 %v775_v17  ;;  %194 = vmatprep.subr.bf16.mxu0 %v798_v27 }
  0x62   :  { %335 = vmatprep.subr.bf16.mxu1 %v776_v19 }
  0x64   :  { %195 = vmatpush1.bf16.msra.mxu0 %v800_v29 }
  0x65   :  { %336 = vmatpush1.bf16.msra.mxu1 %v778_v21  ;;  %196 = vmatprep.subr.bf16.mxu0 %v801_v30 }
  0x66   :  { %337 = vmatprep.subr.bf16.mxu1 %v779_v23 }
  0x68   :  { %197 = vmatpush1.bf16.msra.mxu0 %v803_v31 }
  0x69   :  { %338 = vmatpush1.bf16.msra.mxu1 %v781_v25  ;;  %198 = vmatprep.subr.bf16.mxu0 %v804_v32 }
  0x6c   :  { %356 = vmatmul.mubr.bf16.vlgmr.msra.gmra.mrb[0].mxu1 %v782_v28  ;;  %199 = vmatpush1.bf16.msra.mxu0 %v806_v33 }
  0x6d   :  { %726 = vmatprep.subr.bf16.mxu0 %v807_v34 }
  0x6f   :  { %217 = vmatmul.mubr.bf16.vlgmr.msra.gmra.mrb[0].mxu0 %v782_v28 }
  0x70   :  { %727 = vmatpush3.bf16.msra.mxu0 %v808_v35 }
  0x71   :  { %728 = vmatprep.subr.bf16.mxu0 %v809_v36 }
  0x74   :  { %729 = vmatpush3.bf16.msra.mxu0 %v810_v37 }
  0x75   :  { %730 = vmatprep.subr.bf16.mxu0 %v811_v38 }
  0x78   :  { %731 = vmatpush3.bf16.msra.mxu0 %v812_v39 }
  0x79   :  { %732 = vmatprep.subr.bf16.mxu0 %v813_v40 }
  0x7c   :  { %733 = vmatpush3.bf16.msra.mxu0 %v814_v41 }
  0x7d   :  { %734 = vmatprep.subr.bf16.mxu0 %v815_v42 }
  0x80   :  { %735 = vmatpush3.bf16.msra.mxu0 %v816_v43 }
  0x81   :  { %736 = vmatprep.subr.bf16.mxu0 %v817_v44 }
  0x84   :  { %737 = vmatpush3.bf16.msra.mxu0 %v818_v45 }
  0x85   :  { %738 = vmatprep.subr.bf16.mxu0 %v819_v46 }
  0x88   :  { %739 = vmatpush3.bf16.msra.mxu0 %v820_v47 }
  0x89   :  { %740 = vmatprep.subr.bf16.mxu0 %v821_v48 }
  0x8c   :  { %741 = vmatpush3.bf16.msra.mxu0 %v822_v49 }
 0x13f   :  { %v1059_v50 = vpop.f32.mrb[0].mxu1 }
 0x140   :  { %v1062_v51 = vmul.f32 0.70710677, %v1059_v50  ;;  %v1064_v52 = vpop.f32.mrb[1].mxu1 }
 0x141   :  { %v1067_v53 = vmul.f32 0.70710677, %v1064_v52  ;;  %v1069_v54 = vpop.f32.mrb[2].mxu1 }
 0x142   :  { %v374_v55 = vand.u32 2147483647, %v1062_v51  ;;  %v1073_v56 = vmul.f32 0.70710677, %v1069_v54  ;;  %v1076_v58 = vpop.f32.mrb[3].mxu1  ;;  %v1083_v6 = vpop.f32.mrb[0].mxu0 }
 0x143   :  { %v375_v57 = vand.u32 2147483647, %v1067_v53  ;;  %v1080_v62 = vmul.f32 0.70710677, %v1076_v58  ;;  %v1085_v7 = vpop.f32.mrb[1].mxu0  ;;  %vm450_vm0 = vcmp.lt.f32.partialorder %v1062_v51, 0.0 }
 0x144   :  { %v378_v59 = vmul.f32 0.3275911, %v374_v55  ;;  %v376_v60 = vand.u32 2147483647, %v1073_v56  ;;  %v1087_v8 = vpop.f32.mrb[2].mxu0  ;;  %v426_v9 = vsub.f32 0.0, %v374_v55 }
 0x145   :  { %v379_v61 = vmul.f32 0.3275911, %v375_v57  ;;  %v377_v2 = vand.u32 2147483647, %v1080_v62  ;;  %v1089_v10 = vpop.f32.mrb[3].mxu0  ;;  %v427_v11 = vsub.f32 0.0, %v375_v57 }
 0x146   :  { %v382_v63 = vadd.f32 1.0, %v378_v59  ;;  %v380_v0 = vmul.f32 0.3275911, %v376_v60  ;;  %v430_v13 = vmul.f32 %v426_v9, %v374_v55  ;;  %v428_v14 = vsub.f32 0.0, %v376_v60 }
 0x147   :  { %v383_v1 = vadd.f32 1.0, %v379_v61  ;;  %v381_v4 = vmul.f32 0.3275911, %v377_v2  ;;  %v431_v16 = vmul.f32 %v427_v11, %v375_v57  ;;  %v429_v18 = vsub.f32 0.0, %v377_v2 }
 0x148   :  { %823 = vrcp.f32 %v382_v63  ;;  %v384_v3 = vadd.f32 1.0, %v380_v0  ;;  %v434_v22 = vmul.f32 1.442695, %v430_v13  ;;  %v432_v23 = vmul.f32 %v428_v14, %v376_v60 }
 0x149   :  { %825 = vrcp.f32 %v383_v1  ;;  %v385_v5 = vadd.f32 1.0, %v381_v4  ;;  %v436_v25 = vmul.f32 1.442695, %v431_v16  ;;  %v433_v29 = vmul.f32 %v429_v18, %v377_v2 }
 0x14a   :  { %827 = vrcp.f32 %v384_v3  ;;  %v438_v34 = vmul.f32 1.442695, %v432_v23  ;;  %vm451_vm1 = vcmp.lt.f32.partialorder %v1067_v53, 0.0  ;;  %vm452_vm2 = vcmp.lt.f32.partialorder %v1073_v56, 0.0 }
 0x14b   :  { %829 = vrcp.f32 %v385_v5  ;;  %v440_v39 = vmul.f32 1.442695, %v433_v29  ;;  %v368_v53 = vmul.f32 0.5, %v1069_v54  ;;  %vm453_vm3 = vcmp.lt.f32.partialorder %v1080_v62, 0.0 }
 0x14c   :  { %831 = vpow2.f32 %v434_v22 }
 0x14d   :  { %833 = vpow2.f32 %v436_v25  ;;  %v366_v25 = vmul.f32 0.5, %v1059_v50 }
 0x14e   :  { %835 = vpow2.f32 %v438_v34 }
 0x14f   :  { %837 = vpow2.f32 %v440_v39 }
 0x152   :  { %v824_v12 = vpop.eup %823 }
 0x153   :  { %v826_v15 = vpop.eup %825  ;;  %v390_v17 = vmul.f32 1.0614054, %v824_v12 }
 0x154   :  { %v391_v19 = vmul.f32 1.0614054, %v826_v15  ;;  %v828_v21 = vpop.eup %827 }
 0x155   :  { %v394_v20 = vadd.f32 -1.4531521, %v390_v17  ;;  %v392_v27 = vmul.f32 1.0614054, %v828_v21  ;;  %v830_v28 = vpop.eup %829 }
 0x156   :  { %v395_v24 = vadd.f32 -1.4531521, %v391_v19  ;;  %v393_v33 = vmul.f32 1.0614054, %v830_v28  ;;  %v832_v0 = vpop.eup %831 }
 0x157   :  { %v398_v26 = vmul.f32 %v824_v12, %v394_v20  ;;  %v396_v32 = vadd.f32 -1.4531521, %v392_v27  ;;  %v834_v2 = vpop.eup %833 }
 0x158   :  { %v399_v30 = vmul.f32 %v826_v15, %v395_v24  ;;  %v397_v38 = vadd.f32 -1.4531521, %v393_v33  ;;  %v836_v16 = vpop.eup %835 }
 0x159   :  { %v402_v31 = vadd.f32 1.4214138, %v398_v26  ;;  %v400_v37 = vmul.f32 %v828_v21, %v396_v32  ;;  %v838_v22 = vpop.eup %837 }
 0x15a   :  { %v403_v35 = vadd.f32 1.4214138, %v399_v30  ;;  %v401_v43 = vmul.f32 %v830_v28, %v397_v38 }
 0x15b   :  { %v406_v36 = vmul.f32 %v824_v12, %v402_v31  ;;  %v404_v42 = vadd.f32 1.4214138, %v400_v37 }
 0x15c   :  { %v407_v40 = vmul.f32 %v826_v15, %v403_v35  ;;  %v405_v47 = vadd.f32 1.4214138, %v401_v43 }
 0x15d   :  { %v410_v41 = vadd.f32 -0.28449672, %v406_v36  ;;  %v408_v46 = vmul.f32 %v828_v21, %v404_v42 }
 0x15e   :  { %v411_v44 = vadd.f32 -0.28449672, %v407_v40  ;;  %v409_v57 = vmul.f32 %v830_v28, %v405_v47 }
 0x15f   :  { %v414_v45 = vmul.f32 %v824_v12, %v410_v41  ;;  %v412_v55 = vadd.f32 -0.28449672, %v408_v46 }
 0x160   :  { %v415_v48 = vmul.f32 %v826_v15, %v411_v44  ;;  %v413_v63 = vadd.f32 -0.28449672, %v409_v57 }
 0x161   :  { %v418_v49 = vadd.f32 0.2548296, %v414_v45  ;;  %v416_v61 = vmul.f32 %v828_v21, %v412_v55 }
 0x162   :  { %v419_v59 = vadd.f32 0.2548296, %v415_v48  ;;  %v417_v5 = vmul.f32 %v830_v28, %v413_v63 }
 0x163   :  { %v422_v60 = vmul.f32 %v824_v12, %v418_v49  ;;  %v420_v4 = vadd.f32 0.2548296, %v416_v61 }
 0x164   :  { %v423_v1 = vmul.f32 %v826_v15, %v419_v59  ;;  %v421_v14 = vadd.f32 0.2548296, %v417_v5 }
 0x165   :  { %v442_v3 = vmul.f32 %v832_v0, %v422_v60  ;;  %v424_v13 = vmul.f32 %v828_v21, %v420_v4  ;;  %v367_v21 = vmul.f32 0.5, %v1064_v52  ;;  %v369_v52 = vmul.f32 0.5, %v1076_v58 }
 0x166   :  { %v443_v9 = vmul.f32 %v834_v2, %v423_v1  ;;  %v425_v20 = vmul.f32 %v830_v28, %v421_v14 }
 0x167   :  { %v446_v11 = vsub.f32 1.0, %v442_v3  ;;  %v444_v19 = vmul.f32 %v836_v16, %v424_v13 }
 0x168   :  { %v447_v17 = vsub.f32 1.0, %v443_v9  ;;  %v445_v24 = vmul.f32 %v838_v22, %v425_v20 }
 0x169   :  { %v454_v18 = vsub.f32 0.0, %v446_v11  ;;  %v448_v23 = vsub.f32 1.0, %v444_v19 }
 0x16a   :  { %v455_v12 = vsub.f32 0.0, %v447_v17  ;;  %v449_v31 = vsub.f32 1.0, %v445_v24 }
 0x16b   :  { %v458_v15 = vsel %vm450_vm0, %v454_v18, %v446_v11  ;;  %v456_v30 = vsub.f32 0.0, %v448_v23 }
 0x16c   :  { %v462_v26 = vadd.f32 1.0, %v458_v15  ;;  %v459_v27 = vsel %vm451_vm1, %v455_v12, %v447_v17  ;;  %v457_v33 = vsub.f32 0.0, %v449_v31 }
 0x16d   :  { %v463_v29 = vadd.f32 1.0, %v459_v27  ;;  %v460_v51 = vsel %vm452_vm2, %v456_v30, %v448_v23 }
 0x16e   :  { %v466_v28 = vmul.f32 %v462_v26, %v366_v25  ;;  %v464_v50 = vadd.f32 1.0, %v460_v51  ;;  %v461_v36 = vsel %vm453_vm3, %v457_v33, %v449_v31 }
 0x16f   :  { %v467_v32 = vmul.f32 %v463_v29, %v367_v21  ;;  %v465_v38 = vadd.f32 1.0, %v461_v36 }
 0x170   :  { %v470_v34 = vmul.f32 %v466_v28, %v1083_v6  ;;  %v468_v37 = vmul.f32 %v464_v50, %v368_v53 }
 0x171   :  { %v471_v35 = vmul.f32 %v467_v32, %v1085_v7  ;;  %v469_v39 = vmul.f32 %v465_v38, %v369_v52 }
 0x172   :  { %v472_v56 = vmul.f32 %v468_v37, %v1087_v8 }
 0x173   :  { %v473_v41 = vmul.f32 %v469_v39, %v1089_v10 }
 0x174   :  { %v476_v40 = vpack.c.bf16 %v472_v56, %v470_v34 }
 0x175   :  { %v477_v42 = vpack.c.bf16 %v473_v41, %v471_v35 }
 0x177   :  { %638 = vmatprep.mubr.bf16.mxu0 %v477_v42 }
 0x178   :  { %639 = vmatmul.mubr.bf16.vlgmr.msra.gmra.mrb[4].mxu0 %v476_v40 }
 0x24b   :  { %v742_v54 = vpop.f32.mrb[4].mxu0 }
 0x24c   :  { %v743_v62 = vpop.f32.mrb[5].mxu0 }
 0x24d   :  { %v744_v6 = vadd.f32 %v743_v62, %v742_v54  ;;  %v745_v7 = vpop.f32.mrb[6].mxu0 }
 0x24e   :  { %v746_v43 = vpop.f32.mrb[7].mxu0 }
 0x24f   :  { %656 = vst [vmem:[#allocation11] sm:$0xff] %v744_v6  ;;  %v747_v58 = vadd.f32 %v746_v43, %v745_v7 }
 0x251   :  { %657 = vst [vmem:[#allocation11 + $0x8] sm:$0xff] %v747_v58 }
 0x252   :  { %938 = shalt.err (!%p935_p8)
}
 0x253   :  { %s939_s17 = scalar_lea.hbm %s1122_s4, 256 }
 0x254   :  { %p940_p9 = scmp.ne.s32.totalorder %s1122_s4, %s939_s17  ;;  %p943_p10 = scmp.lt.u32.totalorder %s939_s17, %s1122_s4 }
 0x256   :  { %p945_p11 = pnand %p943_p10, %p940_p9 }
 0x258   :  { %948 = shalt.err (!%p945_p11)
}
 0x259   :  { %669 = dma.vmem_to_hbm [thread:$0]  %s664_s1, 256, %s1122_s4, [#allocation5], %s958_s25, %s958_s25, %s959_s26  }
 0x25a   :  { %955 = dma.done.wait [#allocation5], 256  }
 0x25b   :  { %956 = vsyncadd [#allocation5], 4294967040 }
 0x25c   :  { %673 = vsyncpa [#allocation4], 1 }
 0x25d   :  { %674 = vsyncpa [#allocation7], 1 }
 0x25e   :  { %675 = vsyncpa [#allocation10], 1 }
 0x25f   :  { %676 = vsyncpa [#allocation5], 1 }

// kernel: tpu_custom_call.1
= control target key start
LH: loop header
LB: loop body
LE: loop exit
PB: predicated region body
PF: predicated region fallthrough
CT: control target
= control target key end

     0   :  { %9 = vsyncpa [#allocation4], 0  ;;  %s1118_s0 = inlined_call_operand.hbm [shape: bf16[16,128], index: 0, kind: input, shape index: {}]   ;;  %s1119_s1 = inlined_call_operand.hbm [shape: bf16[128,256], index: 1, kind: input, shape index: {}]   ;;  %s1120_s2 = inlined_call_operand.hbm [shape: bf16[128,256], index: 2, kind: input, shape index: {}]   ;;  %s1121_s3 = inlined_call_operand.hbm [shape: bf16[256,128], index: 3, kind: input, shape index: {}]   ;;  %s1122_s4 = inlined_call_operand.hbm [shape: f32[16,128], index: 4, kind: output, shape index: {}]  }
   0x1   :  { %10 = vsyncpa [#allocation7], 0 }
   0x2   :  { %11 = vsyncpa [#allocation10], 0 }
   0x3   :  { %12 = vsyncpa [#allocation5], 0  ;;  %s957_s15 = smov [#allocation6]   ;;  %s839_s19 = scalar_lea.hbm %s1119_s1, 2048 }
   0x4   :  { %s30_s16 = sshll.u32 %s957_s15, 4  ;;  %p840_p0 = scmp.ne.s32.totalorder %s1119_s1, %s839_s19  ;;  %s31_s16 = int_to_ptr.vmem [resolvable:$true] %s30_s16 }
   0x5   :  { %p843_p1 = scmp.lt.u32.totalorder %s839_s19, %s1119_s1 }
   0x7   :  { %p845_p2 = pnand %p843_p1, %p840_p0 }
   0x9   :  { %848 = shalt.err (!%p845_p2)
}
   0xa   :  { %s849_s24 = scalar_lea.vmem %s31_s16, 2048  ;;  %p854_p4 = scmp.lt.s32.totalorder %s31_s16, %s31_s16 }
   0xb   :  { %p850_p3 = scmp.ne.s32.totalorder %s31_s16, %s849_s24  ;;  %p855_p5 = scmp.lt.s32.totalorder %s849_s24, %s849_s24 }
   0xd   :  { %p856_p6 = por %p855_p5, %p854_p4 }
   0xf   :  { %p857_p7 = pnand %p856_p6, %p850_p3 }
  0x11   :  { %860 = shalt.err (!%p857_p7)
}
  0x12   :  { %s958_s25 = smov 128   ;;  %s959_s26 = smov 8  }
  0x13   :  { %36 = dma.hbm_to_vmem [thread:$0]  %s1119_s1, 2048, %s31_s16, [#allocation7], %s958_s25, %s958_s25, %s959_s26  }
  0x14   :  { %s960_s29 = smov [#allocation3]   ;;  %s861_s7 = scalar_lea.hbm %s1118_s0, 128 }
  0x15   :  { %s18_s30 = sshll.u32 %s960_s29, 4  ;;  %p862_p8 = scmp.ne.s32.totalorder %s1118_s0, %s861_s7  ;;  %s19_s30 = int_to_ptr.vmem [resolvable:$true] %s18_s30 }
  0x16   :  { %p865_p9 = scmp.lt.u32.totalorder %s861_s7, %s1118_s0 }
  0x18   :  { %p867_p10 = pnand %p865_p9, %p862_p8 }
  0x1a   :  { %870 = shalt.err (!%p867_p10)
}
  0x1b   :  { %s871_s12 = scalar_lea.vmem %s19_s30, 128  ;;  %p876_p12 = scmp.lt.s32.totalorder %s19_s30, %s19_s30 }
  0x1c   :  { %p872_p11 = scmp.ne.s32.totalorder %s19_s30, %s871_s12  ;;  %p877_p13 = scmp.lt.s32.totalorder %s871_s12, %s871_s12 }
  0x1e   :  { %p878_p0 = por %p877_p13, %p876_p12 }
  0x20   :  { %p879_p1 = pnand %p878_p0, %p872_p11 }
  0x22   :  { %882 = shalt.err (!%p879_p1)
}
  0x23   :  { %s961_s1 = smov 64   ;;  %s962_s13 = smov 4  }
  0x24   :  { %24 = dma.hbm_to_vmem [thread:$0]  %s1118_s0, 128, %s19_s30, [#allocation4], %s961_s1, %s961_s1, %s962_s13  }
  0x25   :  { %s963_s16 = smov [#allocation8]   ;;  %s964_s18 = smov [#allocation9]  }
  0x26   :  { %s42_s17 = sshll.u32 %s963_s16, 4  ;;  %s54_s19 = sshll.u32 %s964_s18, 4  ;;  %s43_s17 = int_to_ptr.vmem [resolvable:$true] %s42_s17  ;;  %s1022_s19 = int_to_ptr.vmem [resolvable:$true] %s54_s19 }
  0x27   :  { %s883_s22 = scalar_lea.hbm %s1120_s2, 2048 }
  0x28   :  { %p884_p2 = scmp.ne.s32.totalorder %s1120_s2, %s883_s22  ;;  %p887_p3 = scmp.lt.u32.totalorder %s883_s22, %s1120_s2 }
  0x2a   :  { %p889_p4 = pnand %p887_p3, %p884_p2 }
  0x2c   :  { %892 = shalt.err (!%p889_p4)
}
  0x2d   :  { %s893_s0 = scalar_lea.vmem %s43_s17, 2048  ;;  %p898_p6 = scmp.lt.s32.totalorder %s43_s17, %s43_s17 }
  0x2e   :  { %p894_p5 = scmp.ne.s32.totalorder %s43_s17, %s893_s0  ;;  %p899_p7 = scmp.lt.s32.totalorder %s893_s0, %s893_s0 }
  0x30   :  { %p900_p8 = por %p899_p7, %p898_p6 }
  0x32   :  { %p901_p9 = pnand %p900_p8, %p894_p5 }
  0x34   :  { %904 = shalt.err (!%p901_p9)
}
  0x35   :  { %48 = dma.hbm_to_vmem [thread:$0]  %s1120_s2, 2048, %s43_s17, [#allocation7], %s958_s25, %s958_s25, %s959_s26  }
  0x36   :  { %s905_s7 = scalar_lea.hbm %s1121_s3, 2048 }
  0x37   :  { %p906_p10 = scmp.ne.s32.totalorder %s1121_s3, %s905_s7  ;;  %p909_p11 = scmp.lt.u32.totalorder %s905_s7, %s1121_s3 }
  0x39   :  { %p911_p12 = pnand %p909_p11, %p906_p10 }
  0x3b   :  { %914 = shalt.err (!%p911_p12)
}
  0x3c   :  { %s915_s12 = scalar_lea.vmem %s1022_s19, 2048  ;;  %p920_p0 = scmp.lt.s32.totalorder %s1022_s19, %s1022_s19 }
  0x3d   :  { %p916_p13 = scmp.ne.s32.totalorder %s1022_s19, %s915_s12  ;;  %p921_p1 = scmp.lt.s32.totalorder %s915_s12, %s915_s12 }
  0x3f   :  { %p922_p2 = por %p921_p1, %p920_p0 }
  0x41   :  { %p923_p3 = pnand %p922_p2, %p916_p13 }
  0x43   :  { %926 = shalt.err (!%p923_p3)
}
  0x44   :  { %60 = dma.hbm_to_vmem [thread:$0]  %s1121_s3, 2048, %s1022_s19, [#allocation10], %s961_s1, %s961_s1, %s962_s13  }
  0x45   :  { %949 = dma.done.wait [#allocation4], 128  }
  0x46   :  { %950 = vsyncadd [#allocation4], 4294967168 }
  0x47   :  { %951 = dma.done.wait [#allocation7], 4096  }
  0x48   :  { %952 = vsyncadd [#allocation7], 4294963200 }
  0x49   :  { %953 = dma.done.wait [#allocation10], 2048  }
  0x4a   :  { %954 = vsyncadd [#allocation10], 4294965248  ;;  %v965_v0 = vmov 0   ;;  %v758_v1 = vld [vmem:[#allocation8 + $0x4] ss:$8 sps:$4 sm:$0xff]   ;;  %v782_v28 = vld [vmem:[#allocation3] sm:$0xff]  }
  0x4b   :  { %355 = vmatprep.mubr.bf16.mxu1 %v965_v0  ;;  %216 = vmatprep.mubr.bf16.mxu0 %v965_v0  ;;  %v760_v2 = vld [vmem:[#allocation8] ss:$8 sps:$4 sm:$0xff]   ;;  %v761_v3 = vld [vmem:[#allocation8 + $0x14] ss:$8 sps:$4 sm:$0xff]   ;;  %v763_v4 = vld [vmem:[#allocation8 + $0x10] ss:$8 sps:$4 sm:$0xff]  }
  0x4c   :  { %323 = vmatprep.subr.bf16.mxu1 %v758_v1  ;;  %v764_v5 = vld [vmem:[#allocation8 + $0x24] ss:$8 sps:$4 sm:$0xff]   ;;  %v766_v6 = vld [vmem:[#allocation8 + $0x20] ss:$8 sps:$4 sm:$0xff]   ;;  %v767_v7 = vld [vmem:[#allocation8 + $0x34] ss:$8 sps:$4 sm:$0xff]  }
  0x4d   :  { %324 = vmatpush1.bf16.msra.mxu1 %v760_v2  ;;  %v769_v8 = vld [vmem:[#allocation8 + $0x30] ss:$8 sps:$4 sm:$0xff]   ;;  %v770_v9 = vld [vmem:[#allocation8 + $0x44] ss:$8 sps:$4 sm:$0xff]   ;;  %v785_v11 = vld [vmem:[#allocation6] ss:$8 sps:$4 sm:$0xff]  }
  0x4e   :  { %325 = vmatprep.subr.bf16.mxu1 %v761_v3  ;;  %v783_v10 = vld [vmem:[#allocation6 + $0x4] ss:$8 sps:$4 sm:$0xff]   ;;  %v786_v12 = vld [vmem:[#allocation6 + $0x14] ss:$8 sps:$4 sm:$0xff]   ;;  %v772_v13 = vld [vmem:[#allocation8 + $0x40] ss:$8 sps:$4 sm:$0xff]  }
  0x4f   :  { %184 = vmatprep.subr.bf16.mxu0 %v783_v10  ;;  %v788_v14 = vld [vmem:[#allocation6 + $0x10] ss:$8 sps:$4 sm:$0xff]   ;;  %v773_v15 = vld [vmem:[#allocation8 + $0x54] ss:$8 sps:$4 sm:$0xff]   ;;  %v789_v16 = vld [vmem:[#allocation6 + $0x24] ss:$8 sps:$4 sm:$0xff]  }
  0x50   :  { %185 = vmatpush1.bf16.msra.mxu0 %v785_v11  ;;  %v775_v17 = vld [vmem:[#allocation8 + $0x50] ss:$8 sps:$4 sm:$0xff]   ;;  %v791_v18 = vld [vmem:[#allocation6 + $0x20] ss:$8 sps:$4 sm:$0xff]   ;;  %v776_v19 = vld [vmem:[#allocation8 + $0x64] ss:$8 sps:$4 sm:$0xff]  }
  0x51   :  { %326 = vmatpush1.bf16.msra.mxu1 %v763_v4  ;;  %186 = vmatprep.subr.bf16.mxu0 %v786_v12  ;;  %v792_v20 = vld [vmem:[#allocation6 + $0x34] ss:$8 sps:$4 sm:$0xff]   ;;  %v778_v21 = vld [vmem:[#allocation8 + $0x60] ss:$8 sps:$4 sm:$0xff]   ;;  %v794_v22 = vld [vmem:[#allocation6 + $0x30] ss:$8 sps:$4 sm:$0xff]  }
  0x52   :  { %327 = vmatprep.subr.bf16.mxu1 %v764_v5  ;;  %v779_v23 = vld [vmem:[#allocation8 + $0x74] ss:$8 sps:$4 sm:$0xff]   ;;  %v795_v24 = vld [vmem:[#allocation6 + $0x44] ss:$8 sps:$4 sm:$0xff]   ;;  %v781_v25 = vld [vmem:[#allocation8 + $0x70] ss:$8 sps:$4 sm:$0xff]  }
  0x53   :  { %v797_v26 = vld [vmem:[#allocation6 + $0x40] ss:$8 sps:$4 sm:$0xff]   ;;  %v798_v27 = vld [vmem:[#allocation6 + $0x54] ss:$8 sps:$4 sm:$0xff]   ;;  %v800_v29 = vld [vmem:[#allocation6 + $0x50] ss:$8 sps:$4 sm:$0xff]  }
  0x54   :  { %187 = vmatpush1.bf16.msra.mxu0 %v788_v14  ;;  %v801_v30 = vld [vmem:[#allocation6 + $0x64] ss:$8 sps:$4 sm:$0xff]   ;;  %v803_v31 = vld [vmem:[#allocation6 + $0x60] ss:$8 sps:$4 sm:$0xff]   ;;  %v804_v32 = vld [vmem:[#allocation6 + $0x74] ss:$8 sps:$4 sm:$0xff]  }
  0x55   :  { %328 = vmatpush1.bf16.msra.mxu1 %v766_v6  ;;  %188 = vmatprep.subr.bf16.mxu0 %v789_v16  ;;  %v806_v33 = vld [vmem:[#allocation6 + $0x70] ss:$8 sps:$4 sm:$0xff]   ;;  %v807_v34 = vld [vmem:[#allocation9 + $0x40] sm:$0xff]   ;;  %v809_v36 = vld [vmem:[#allocation9 + $0x48] sm:$0xff]   ;;  %s966_s3 = smov [#allocation11]  }
  0x56   :  { %329 = vmatprep.subr.bf16.mxu1 %v767_v7  ;;  %v808_v35 = vld [vmem:[#allocation9] sm:$0xff]   ;;  %v810_v37 = vld [vmem:[#allocation9 + $0x8] sm:$0xff]   ;;  %v811_v38 = vld [vmem:[#allocation9 + $0x50] sm:$0xff]   ;;  %s663_s1 = sshll.u32 %s966_s3, 4  ;;  %s664_s1 = int_to_ptr.vmem [resolvable:$true] %s663_s1 }
  0x57   :  { %v812_v39 = vld [vmem:[#allocation9 + $0x10] sm:$0xff]   ;;  %v813_v40 = vld [vmem:[#allocation9 + $0x58] sm:$0xff]   ;;  %v815_v42 = vld [vmem:[#allocation9 + $0x60] sm:$0xff]   ;;  %s927_s13 = scalar_lea.vmem %s664_s1, 256  ;;  %p932_p5 = scmp.lt.s32.totalorder %s664_s1, %s664_s1 }
  0x58   :  { %189 = vmatpush1.bf16.msra.mxu0 %v791_v18  ;;  %v814_v41 = vld [vmem:[#allocation9 + $0x18] sm:$0xff]   ;;  %v816_v43 = vld [vmem:[#allocation9 + $0x20] sm:$0xff]   ;;  %v817_v44 = vld [vmem:[#allocation9 + $0x68] sm:$0xff]   ;;  %p928_p4 = scmp.ne.s32.totalorder %s664_s1, %s927_s13  ;;  %p933_p6 = scmp.lt.s32.totalorder %s927_s13, %s927_s13 }
  0x59   :  { %330 = vmatpush1.bf16.msra.mxu1 %v769_v8  ;;  %190 = vmatprep.subr.bf16.mxu0 %v792_v20  ;;  %v818_v45 = vld [vmem:[#allocation9 + $0x28] sm:$0xff]   ;;  %v819_v46 = vld [vmem:[#allocation9 + $0x70] sm:$0xff]   ;;  %v821_v48 = vld [vmem:[#allocation9 + $0x78] sm:$0xff]  }
  0x5a   :  { %331 = vmatprep.subr.bf16.mxu1 %v770_v9  ;;  %v820_v47 = vld [vmem:[#allocation9 + $0x30] sm:$0xff]   ;;  %v822_v49 = vld [vmem:[#allocation9 + $0x38] sm:$0xff]   ;;  %p934_p7 = por %p933_p6, %p932_p5 }
  0x5c   :  { %191 = vmatpush1.bf16.msra.mxu0 %v794_v22  ;;  %p935_p8 = pnand %p934_p7, %p928_p4 }
  0x5d   :  { %332 = vmatpush1.bf16.msra.mxu1 %v772_v13  ;;  %192 = vmatprep.subr.bf16.mxu0 %v795_v24 }
  0x5e   :  { %333 = vmatprep.subr.bf16.mxu1 %v773_v15 }
  0x60   :  { %193 = vmatpush1.bf16.msra.mxu0 %v797_v26 }
  0x61   :  { %334 = vmatpush1.bf16.msra.mxu1 %v775_v17  ;;  %194 = vmatprep.subr.bf16.mxu0 %v798_v27 }
  0x62   :  { %335 = vmatprep.subr.bf16.mxu1 %v776_v19 }
  0x64   :  { %195 = vmatpush1.bf16.msra.mxu0 %v800_v29 }
  0x65   :  { %336 = vmatpush1.bf16.msra.mxu1 %v778_v21  ;;  %196 = vmatprep.subr.bf16.mxu0 %v801_v30 }
  0x66   :  { %337 = vmatprep.subr.bf16.mxu1 %v779_v23 }
  0x68   :  { %197 = vmatpush1.bf16.msra.mxu0 %v803_v31 }
  0x69   :  { %338 = vmatpush1.bf16.msra.mxu1 %v781_v25  ;;  %198 = vmatprep.subr.bf16.mxu0 %v804_v32 }
  0x6c   :  { %356 = vmatmul.mubr.bf16.vlgmr.msra.gmra.mrb[0].mxu1 %v782_v28  ;;  %199 = vmatpush1.bf16.msra.mxu0 %v806_v33 }
  0x6d   :  { %726 = vmatprep.subr.bf16.mxu0 %v807_v34 }
  0x6f   :  { %217 = vmatmul.mubr.bf16.vlgmr.msra.gmra.mrb[0].mxu0 %v782_v28 }
  0x70   :  { %727 = vmatpush3.bf16.msra.mxu0 %v808_v35 }
  0x71   :  { %728 = vmatprep.subr.bf16.mxu0 %v809_v36 }
  0x74   :  { %729 = vmatpush3.bf16.msra.mxu0 %v810_v37 }
  0x75   :  { %730 = vmatprep.subr.bf16.mxu0 %v811_v38 }
  0x78   :  { %731 = vmatpush3.bf16.msra.mxu0 %v812_v39 }
  0x79   :  { %732 = vmatprep.subr.bf16.mxu0 %v813_v40 }
  0x7c   :  { %733 = vmatpush3.bf16.msra.mxu0 %v814_v41 }
  0x7d   :  { %734 = vmatprep.subr.bf16.mxu0 %v815_v42 }
  0x80   :  { %735 = vmatpush3.bf16.msra.mxu0 %v816_v43 }
  0x81   :  { %736 = vmatprep.subr.bf16.mxu0 %v817_v44 }
  0x84   :  { %737 = vmatpush3.bf16.msra.mxu0 %v818_v45 }
  0x85   :  { %738 = vmatprep.subr.bf16.mxu0 %v819_v46 }
  0x88   :  { %739 = vmatpush3.bf16.msra.mxu0 %v820_v47 }
  0x89   :  { %740 = vmatprep.subr.bf16.mxu0 %v821_v48 }
  0x8c   :  { %741 = vmatpush3.bf16.msra.mxu0 %v822_v49 }
 0x13f   :  { %v1059_v50 = vpop.f32.mrb[0].mxu1 }
 0x140   :  { %v1062_v51 = vmul.f32 0.70710677, %v1059_v50  ;;  %v1064_v52 = vpop.f32.mrb[1].mxu1 }
 0x141   :  { %v1067_v53 = vmul.f32 0.70710677, %v1064_v52  ;;  %v1069_v54 = vpop.f32.mrb[2].mxu1 }
 0x142   :  { %v374_v55 = vand.u32 2147483647, %v1062_v51  ;;  %v1073_v56 = vmul.f32 0.70710677, %v1069_v54  ;;  %v1076_v58 = vpop.f32.mrb[3].mxu1  ;;  %v1083_v6 = vpop.f32.mrb[0].mxu0 }
 0x143   :  { %v375_v57 = vand.u32 2147483647, %v1067_v53  ;;  %v1080_v62 = vmul.f32 0.70710677, %v1076_v58  ;;  %v1085_v7 = vpop.f32.mrb[1].mxu0  ;;  %vm450_vm0 = vcmp.lt.f32.partialorder %v1062_v51, 0.0 }
 0x144   :  { %v378_v59 = vmul.f32 0.3275911, %v374_v55  ;;  %v376_v60 = vand.u32 2147483647, %v1073_v56  ;;  %v1087_v8 = vpop.f32.mrb[2].mxu0  ;;  %v426_v9 = vsub.f32 0.0, %v374_v55 }
 0x145   :  { %v379_v61 = vmul.f32 0.3275911, %v375_v57  ;;  %v377_v2 = vand.u32 2147483647, %v1080_v62  ;;  %v1089_v10 = vpop.f32.mrb[3].mxu0  ;;  %v427_v11 = vsub.f32 0.0, %v375_v57 }
 0x146   :  { %v382_v63 = vadd.f32 1.0, %v378_v59  ;;  %v380_v0 = vmul.f32 0.3275911, %v376_v60  ;;  %v430_v13 = vmul.f32 %v426_v9, %v374_v55  ;;  %v428_v14 = vsub.f32 0.0, %v376_v60 }
 0x147   :  { %v383_v1 = vadd.f32 1.0, %v379_v61  ;;  %v381_v4 = vmul.f32 0.3275911, %v377_v2  ;;  %v431_v16 = vmul.f32 %v427_v11, %v375_v57  ;;  %v429_v18 = vsub.f32 0.0, %v377_v2 }
 0x148   :  { %823 = vrcp.f32 %v382_v63  ;;  %v384_v3 = vadd.f32 1.0, %v380_v0  ;;  %v434_v22 = vmul.f32 1.442695, %v430_v13  ;;  %v432_v23 = vmul.f32 %v428_v14, %v376_v60 }
 0x149   :  { %825 = vrcp.f32 %v383_v1  ;;  %v385_v5 = vadd.f32 1.0, %v381_v4  ;;  %v436_v25 = vmul.f32 1.442695, %v431_v16  ;;  %v433_v29 = vmul.f32 %v429_v18, %v377_v2 }
 0x14a   :  { %827 = vrcp.f32 %v384_v3  ;;  %v438_v34 = vmul.f32 1.442695, %v432_v23  ;;  %vm451_vm1 = vcmp.lt.f32.partialorder %v1067_v53, 0.0  ;;  %vm452_vm2 = vcmp.lt.f32.partialorder %v1073_v56, 0.0 }
 0x14b   :  { %829 = vrcp.f32 %v385_v5  ;;  %v440_v39 = vmul.f32 1.442695, %v433_v29  ;;  %v368_v53 = vmul.f32 0.5, %v1069_v54  ;;  %vm453_vm3 = vcmp.lt.f32.partialorder %v1080_v62, 0.0 }
 0x14c   :  { %831 = vpow2.f32 %v434_v22 }
 0x14d   :  { %833 = vpow2.f32 %v436_v25  ;;  %v366_v25 = vmul.f32 0.5, %v1059_v50 }
 0x14e   :  { %835 = vpow2.f32 %v438_v34 }
 0x14f   :  { %837 = vpow2.f32 %v440_v39 }
 0x152   :  { %v824_v12 = vpop.eup %823 }
 0x153   :  { %v826_v15 = vpop.eup %825  ;;  %v390_v17 = vmul.f32 1.0614054, %v824_v12 }
 0x154   :  { %v391_v19 = vmul.f32 1.0614054, %v826_v15  ;;  %v828_v21 = vpop.eup %827 }
 0x155   :  { %v394_v20 = vadd.f32 -1.4531521, %v390_v17  ;;  %v392_v27 = vmul.f32 1.0614054, %v828_v21  ;;  %v830_v28 = vpop.eup %829 }
 0x156   :  { %v395_v24 = vadd.f32 -1.4531521, %v391_v19  ;;  %v393_v33 = vmul.f32 1.0614054, %v830_v28  ;;  %v832_v0 = vpop.eup %831 }
 0x157   :  { %v398_v26 = vmul.f32 %v824_v12, %v394_v20  ;;  %v396_v32 = vadd.f32 -1.4531521, %v392_v27  ;;  %v834_v2 = vpop.eup %833 }
 0x158   :  { %v399_v30 = vmul.f32 %v826_v15, %v395_v24  ;;  %v397_v38 = vadd.f32 -1.4531521, %v393_v33  ;;  %v836_v16 = vpop.eup %835 }
 0x159   :  { %v402_v31 = vadd.f32 1.4214138, %v398_v26  ;;  %v400_v37 = vmul.f32 %v828_v21, %v396_v32  ;;  %v838_v22 = vpop.eup %837 }
 0x15a   :  { %v403_v35 = vadd.f32 1.4214138, %v399_v30  ;;  %v401_v43 = vmul.f32 %v830_v28, %v397_v38 }
 0x15b   :  { %v406_v36 = vmul.f32 %v824_v12, %v402_v31  ;;  %v404_v42 = vadd.f32 1.4214138, %v400_v37 }
 0x15c   :  { %v407_v40 = vmul.f32 %v826_v15, %v403_v35  ;;  %v405_v47 = vadd.f32 1.4214138, %v401_v43 }
 0x15d   :  { %v410_v41 = vadd.f32 -0.28449672, %v406_v36  ;;  %v408_v46 = vmul.f32 %v828_v21, %v404_v42 }
 0x15e   :  { %v411_v44 = vadd.f32 -0.28449672, %v407_v40  ;;  %v409_v57 = vmul.f32 %v830_v28, %v405_v47 }
 0x15f   :  { %v414_v45 = vmul.f32 %v824_v12, %v410_v41  ;;  %v412_v55 = vadd.f32 -0.28449672, %v408_v46 }
 0x160   :  { %v415_v48 = vmul.f32 %v826_v15, %v411_v44  ;;  %v413_v63 = vadd.f32 -0.28449672, %v409_v57 }
 0x161   :  { %v418_v49 = vadd.f32 0.2548296, %v414_v45  ;;  %v416_v61 = vmul.f32 %v828_v21, %v412_v55 }
 0x162   :  { %v419_v59 = vadd.f32 0.2548296, %v415_v48  ;;  %v417_v5 = vmul.f32 %v830_v28, %v413_v63 }
 0x163   :  { %v422_v60 = vmul.f32 %v824_v12, %v418_v49  ;;  %v420_v4 = vadd.f32 0.2548296, %v416_v61 }
 0x164   :  { %v423_v1 = vmul.f32 %v826_v15, %v419_v59  ;;  %v421_v14 = vadd.f32 0.2548296, %v417_v5 }
 0x165   :  { %v442_v3 = vmul.f32 %v832_v0, %v422_v60  ;;  %v424_v13 = vmul.f32 %v828_v21, %v420_v4  ;;  %v367_v21 = vmul.f32 0.5, %v1064_v52  ;;  %v369_v52 = vmul.f32 0.5, %v1076_v58 }
 0x166   :  { %v443_v9 = vmul.f32 %v834_v2, %v423_v1  ;;  %v425_v20 = vmul.f32 %v830_v28, %v421_v14 }
 0x167   :  { %v446_v11 = vsub.f32 1.0, %v442_v3  ;;  %v444_v19 = vmul.f32 %v836_v16, %v424_v13 }
 0x168   :  { %v447_v17 = vsub.f32 1.0, %v443_v9  ;;  %v445_v24 = vmul.f32 %v838_v22, %v425_v20 }
 0x169   :  { %v454_v18 = vsub.f32 0.0, %v446_v11  ;;  %v448_v23 = vsub.f32 1.0, %v444_v19 }
 0x16a   :  { %v455_v12 = vsub.f32 0.0, %v447_v17  ;;  %v449_v31 = vsub.f32 1.0, %v445_v24 }
 0x16b   :  { %v458_v15 = vsel %vm450_vm0, %v454_v18, %v446_v11  ;;  %v456_v30 = vsub.f32 0.0, %v448_v23 }
 0x16c   :  { %v462_v26 = vadd.f32 1.0, %v458_v15  ;;  %v459_v27 = vsel %vm451_vm1, %v455_v12, %v447_v17  ;;  %v457_v33 = vsub.f32 0.0, %v449_v31 }
 0x16d   :  { %v463_v29 = vadd.f32 1.0, %v459_v27  ;;  %v460_v51 = vsel %vm452_vm2, %v456_v30, %v448_v23 }
 0x16e   :  { %v466_v28 = vmul.f32 %v462_v26, %v366_v25  ;;  %v464_v50 = vadd.f32 1.0, %v460_v51  ;;  %v461_v36 = vsel %vm453_vm3, %v457_v33, %v449_v31 }
 0x16f   :  { %v467_v32 = vmul.f32 %v463_v29, %v367_v21  ;;  %v465_v38 = vadd.f32 1.0, %v461_v36 }
 0x170   :  { %v470_v34 = vmul.f32 %v466_v28, %v1083_v6  ;;  %v468_v37 = vmul.f32 %v464_v50, %v368_v53 }
 0x171   :  { %v471_v35 = vmul.f32 %v467_v32, %v1085_v7  ;;  %v469_v39 = vmul.f32 %v465_v38, %v369_v52 }
 0x172   :  { %v472_v56 = vmul.f32 %v468_v37, %v1087_v8 }
 0x173   :  { %v473_v41 = vmul.f32 %v469_v39, %v1089_v10 }
 0x174   :  { %v476_v40 = vpack.c.bf16 %v472_v56, %v470_v34 }
 0x175   :  { %v477_v42 = vpack.c.bf16 %v473_v41, %v471_v35 }
 0x177   :  { %638 = vmatprep.mubr.bf16.mxu0 %v477_v42 }
 0x178   :  { %639 = vmatmul.mubr.bf16.vlgmr.msra.gmra.mrb[4].mxu0 %v476_v40 }
 0x24b   :  { %v742_v54 = vpop.f32.mrb[4].mxu0 }
 0x24c   :  { %v743_v62 = vpop.f32.mrb[5].mxu0 }
 0x24d   :  { %v744_v6 = vadd.f32 %v743_v62, %v742_v54  ;;  %v745_v7 = vpop.f32.mrb[6].mxu0 }
 0x24e   :  { %v746_v43 = vpop.f32.mrb[7].mxu0 }
 0x24f   :  { %656 = vst [vmem:[#allocation11] sm:$0xff] %v744_v6  ;;  %v747_v58 = vadd.f32 %v746_v43, %v745_v7 }
 0x251   :  { %657 = vst [vmem:[#allocation11 + $0x8] sm:$0xff] %v747_v58 }
 0x252   :  { %938 = shalt.err (!%p935_p8)
}
 0x253   :  { %s939_s17 = scalar_lea.hbm %s1122_s4, 256 }
 0x254   :  { %p940_p9 = scmp.ne.s32.totalorder %s1122_s4, %s939_s17  ;;  %p943_p10 = scmp.lt.u32.totalorder %s939_s17, %s1122_s4 }
 0x256   :  { %p945_p11 = pnand %p943_p10, %p940_p9 }
 0x258   :  { %948 = shalt.err (!%p945_p11)
}
 0x259   :  { %669 = dma.vmem_to_hbm [thread:$0]  %s664_s1, 256, %s1122_s4, [#allocation5], %s958_s25, %s958_s25, %s959_s26  }
 0x25a   :  { %955 = dma.done.wait [#allocation5], 256  }
 0x25b   :  { %956 = vsyncadd [#allocation5], 4294967040 }
 0x25c   :  { %673 = vsyncpa [#allocation4], 1 }
 0x25d   :  { %674 = vsyncpa [#allocation7], 1 }
 0x25e   :  { %675 = vsyncpa [#allocation10], 1 }
 0x25f   :  { %676 = vsyncpa [#allocation5], 1 }

</bundles_post_ra>
